<compile_context>
chip_gen: v7x
topology: tpu7x:2x2x1
jax: 0.10.0
libtpu: 0.0.40
codegen_flags: <defaults>
</compile_context>

<pallas_src>
import math

import jax
import jax.numpy as jnp
from jax.experimental import pallas as pl
from jax.experimental.pallas import tpu as pltpu


# ---------------------------------------------------------------------------
# Positional encoding buffer (get_pe from RoLD, in JAX)
# ---------------------------------------------------------------------------

def get_pe(hidden_size: int, max_len: int) -> jnp.ndarray:
    """Standard sinusoidal positional encoding, shape (1, max_len, hidden_size)."""
    position = jnp.arange(max_len, dtype=jnp.float32)[:, None]
    div_term = jnp.exp(
        jnp.arange(0, hidden_size, 2, dtype=jnp.float32)
        * (-math.log(10000.0) / hidden_size)
    )
    pe = jnp.zeros((max_len, hidden_size), jnp.float32)
    pe = pe.at[:, 0::2].set(jnp.sin(position * div_term))
    pe = pe.at[:, 1::2].set(jnp.cos(position * div_term))
    return pe[None]                                  # (1, max_len, hidden)


# ---------------------------------------------------------------------------
# Fused Pallas kernel: linear projection + bias + positional encoding
# ---------------------------------------------------------------------------

def _action2embedding_kernel(x_ref, w_ref, b_ref, pe_ref, o_ref):
    """One (seq-tile, batch) block: o = x @ W.T + b + pe  (everything fused)."""
    x = x_ref[0]                                     # (ts, A)
    w = w_ref[...]                                   # (H, A)  PyTorch (out, in) layout
    # Transposed contraction: contract last dim of both operands -> the MXU is
    # fed directly (no XLU transpose).  f32 accumulation.
    y = jax.lax.dot_general(
        x, w, (((1,), (1,)), ((), ())), preferred_element_type=jnp.float32
    )                                                # (ts, H)
    # Bias + PE add: cheap VPU work, hidden under the matmul / DMA.
    o_ref[0] = (y + b_ref[...] + pe_ref[...]).astype(o_ref.dtype)


def _pick_seq_tile(seq_len: int, max_tile: int = 512) -> int:
    """Largest sequence tile (multiple of 8, <= max_tile) that divides S.

    Falls back to the full sequence length (always a legal block shape)."""
    if seq_len <= max_tile:
        return seq_len
    for ts in range(max_tile, 7, -8):                # 512, 504, ..., 16, 8
        if seq_len % ts == 0:
            return ts
    return seq_len


def action2embedding_forward(actions, weight, bias, pe):
    """actions: (B, S, A); weight: (H, A); bias: (H,); pe: (1, max_len, H)."""
    B, S, A = actions.shape
    H = weight.shape[0]

    pe_s = jax.lax.slice(pe, (0, 0, 0), (1, S, H))[0]    # pe[:, :S, :] -> (S, H)
    bias2d = bias.reshape(1, H)                          # hoisted once per call
    ts = _pick_seq_tile(S)
    grid = (S // ts, B)                                  # batch innermost: PE tile
                                                         # only re-DMA'd per seq tile
    out_dtype = actions.dtype

    return pl.pallas_call(
        _action2embedding_kernel,
        grid=grid,
        in_specs=[
            # activations: one (1, ts, A) tile per grid step
            pl.BlockSpec((1, ts, A), lambda s, b: (b, s, 0)),
            # weight / bias: constant index_map -> DMA'd once, VMEM-resident
            pl.BlockSpec((H, A), lambda s, b: (0, 0)),
            pl.BlockSpec((1, H), lambda s, b: (0, 0)),
            # positional encoding: indexed by the (outer) sequence-tile only
            pl.BlockSpec((ts, H), lambda s, b: (s, 0)),
        ],
        out_specs=pl.BlockSpec((1, ts, H), lambda s, b: (b, s, 0)),
        out_shape=jax.ShapeDtypeStruct((B, S, H), out_dtype),
        compiler_params=pltpu.CompilerParams(
            dimension_semantics=("parallel", "parallel")
        ),
    )(actions, weight, bias2d, pe_s)


# ---------------------------------------------------------------------------
# Pure-JAX reference (correctness check)
# ---------------------------------------------------------------------------

def reference_forward(actions, weight, bias, pe):
    S = actions.shape[1]
    return actions @ weight.T + bias + pe[:, :S, :]


# ---------------------------------------------------------------------------

if __name__ == "__main__":
    action_dim, hidden, horizon = 7, 32, 8
    B, S = 2, 8                                       # S <= 2 * horizon

    key = jax.random.PRNGKey(0)
    k_act, k_w, k_b = jax.random.split(key, 3)
    actions = jax.random.normal(k_act, (B, S, action_dim), jnp.float32)
    weight = 0.02 * jax.random.normal(k_w, (hidden, action_dim), jnp.float32)
    bias = 0.01 * jax.random.normal(k_b, (hidden,), jnp.float32)
    pe = get_pe(hidden_size=hidden, max_len=2 * horizon)

    out = jax.block_until_ready(action2embedding_forward(actions, weight, bias, pe))
    ref = jax.block_until_ready(reference_forward(actions, weight, bias, pe))

    assert out.shape == (B, S, hidden), out.shape
    assert jnp.allclose(out, ref, atol=1e-5, rtol=1e-5), float(
        jnp.max(jnp.abs(out - ref))
    )

    print("KERNEL_OK")
</pallas_src>

<mosaic_0001>
module attributes {stable_mosaic.version = 11 : i64} {
  func.func @_action2embedding_kernel(%arg0: i32, %arg1: i32, %arg2: memref<1x8x7xf32, #tpu.memory_space<vmem>>, %arg3: memref<32x7xf32, #tpu.memory_space<vmem>>, %arg4: memref<1x32xf32, #tpu.memory_space<vmem>>, %arg5: memref<8x32xf32, #tpu.memory_space<vmem>>, %arg6: memref<1x8x32xf32, #tpu.memory_space<vmem>>) attributes {dimension_semantics = [#tpu.dimension_semantics<parallel>, #tpu.dimension_semantics<parallel>], iteration_bounds = array<i64: 1, 2>, scalar_prefetch = 0 : i64, scratch_operands = 0 : i64, tpu.core_type = #tpu.core_type<tc>, window_params = [{transform_indices = @transform_0, window_bounds = array<i64: 1, 8, 7>}, {pipeline_mode = #tpu.pipeline_mode<synchronous>, transform_indices = @transform_1, window_bounds = array<i64: 32, 7>}, {pipeline_mode = #tpu.pipeline_mode<synchronous>, transform_indices = @transform_2, window_bounds = array<i64: 1, 32>}, {transform_indices = @transform_3, window_bounds = array<i64: 8, 32>}, {transform_indices = @transform_4, window_bounds = array<i64: 1, 8, 32>}]} {
    %c0 = arith.constant 0 : index
    %c0_0 = arith.constant 0 : index
    %c0_1 = arith.constant 0 : index
    %0 = vector.load %arg2[%c0, %c0_0, %c0_1] : memref<1x8x7xf32, #tpu.memory_space<vmem>>, vector<1x8x7xf32>
    %1 = vector.shape_cast %0 : vector<1x8x7xf32> to vector<8x7xf32>
    %c0_2 = arith.constant 0 : index
    %c0_3 = arith.constant 0 : index
    %2 = vector.load %arg3[%c0_2, %c0_3] : memref<32x7xf32, #tpu.memory_space<vmem>>, vector<32x7xf32>
    %cst = arith.constant dense<0.000000e+00> : vector<8x32xf32>
    %3 = tpu.matmul %1, %2, %cst {dimension_numbers = #tpu.dot_dimension_numbers<[1], [1], [0], [0], [0, 0, 1, 0], [], []>} : vector<8x7xf32>, vector<32x7xf32>, vector<8x32xf32> -> vector<8x32xf32>
    %c0_4 = arith.constant 0 : index
    %c0_5 = arith.constant 0 : index
    %4 = vector.load %arg4[%c0_4, %c0_5] : memref<1x32xf32, #tpu.memory_space<vmem>>, vector<1x32xf32>
    %5 = vector.broadcast %4 : vector<1x32xf32> to vector<8x32xf32>
    %6 = arith.addf %3, %5 : vector<8x32xf32>
    %c0_6 = arith.constant 0 : index
    %c0_7 = arith.constant 0 : index
    %7 = vector.load %arg5[%c0_6, %c0_7] : memref<8x32xf32, #tpu.memory_space<vmem>>, vector<8x32xf32>
    %8 = arith.addf %6, %7 : vector<8x32xf32>
    %c0_8 = arith.constant 0 : index
    %c0_9 = arith.constant 0 : index
    %c0_10 = arith.constant 0 : index
    %9 = vector.load %arg6[%c0_8, %c0_9, %c0_10] : memref<1x8x32xf32, #tpu.memory_space<vmem>>, vector<1x8x32xf32>
    %10 = vector.shape_cast %9 : vector<1x8x32xf32> to vector<8x32xf32>
    %11 = vector.shape_cast %8 : vector<8x32xf32> to vector<1x8x32xf32>
    tpu.vector_store %arg6[%c0_8, %c0_9, %c0_10], %11 {strides = array<i32>} : memref<1x8x32xf32, #tpu.memory_space<vmem>>, vector<1x8x32xf32>,
    return
  }
  func.func @transform_0(%arg0: i32, %arg1: i32) -> (i32, i32, i32) {
    %c0_i32 = arith.constant 0 : i32
    %c0_i32_0 = arith.constant 0 : i32
    return %arg1, %arg0, %c0_i32 : i32, i32, i32
  }
  func.func @transform_1(%arg0: i32, %arg1: i32) -> (i32, i32) {
    %c0_i32 = arith.constant 0 : i32
    %c0_i32_0 = arith.constant 0 : i32
    %c0_i32_1 = arith.constant 0 : i32
    return %c0_i32, %c0_i32_0 : i32, i32
  }
  func.func @transform_2(%arg0: i32, %arg1: i32) -> (i32, i32) {
    %c0_i32 = arith.constant 0 : i32
    %c0_i32_0 = arith.constant 0 : i32
    %c0_i32_1 = arith.constant 0 : i32
    return %c0_i32, %c0_i32_0 : i32, i32
  }
  func.func @transform_3(%arg0: i32, %arg1: i32) -> (i32, i32) {
    %c0_i32 = arith.constant 0 : i32
    %c0_i32_0 = arith.constant 0 : i32
    return %arg0, %c0_i32 : i32, i32
  }
  func.func @transform_4(%arg0: i32, %arg1: i32) -> (i32, i32, i32) {
    %c0_i32 = arith.constant 0 : i32
    %c0_i32_0 = arith.constant 0 : i32
    return %arg1, %arg0, %c0_i32 : i32, i32, i32
  }
}

</mosaic_0001>

<bundles_post_ra>
// kernel: tpu_custom_call.1
= control target key start
LH: loop header
LB: loop body
LE: loop exit
PB: predicated region body
PF: predicated region fallthrough
CT: control target
= control target key end

     0   :  { %9 = vsyncpa [#allocation3], 0  ;;  %s780_s0 = inlined_call_operand.vmem [shape: f32[2,8,7], index: 0, kind: input, shape index: {}]   ;;  %s781_s1 = inlined_call_operand.vmem [shape: f32[32,7], index: 1, kind: input, shape index: {}]   ;;  %s782_s2 = inlined_call_operand.vmem [shape: f32[1,32], index: 2, kind: input, shape index: {}]   ;;  %s783_s3 = inlined_call_operand.vmem [shape: f32[8,32], index: 3, kind: input, shape index: {}]   ;;  %s784_s4 = inlined_call_operand.hbm [shape: f32[2,8,32], index: 4, kind: output, shape index: {}]  }
   0x1   :  { %11 = vsyncpa [#allocation3 + $0x1], 0  ;;  %s647_s15 = smov 0   ;;  %s649_s16 = smov 0  }
   0x2   :  { %s651_s17 = smov 0   ;;  %s653_s18 = smov 0  }
   0x3   :  { %s655_s19 = smov 0   ;;  %s657_s20 = smov 0  }
   0x4 LB: > { %s438_s21 = sadd.s32 4294967295, %s616_s20   ;;  %s439_s22 = sadd.s32 4294967294, %s616_s20   ;;  %s616_s20 = sphi %s657_s20, %s17_s20   ;;  %s612_s19 = sphi %s655_s19, %s791_s19   ;;  %s608_s18 = sphi %s653_s18, %s790_s18   ;;  %s604_s17 = sphi %s651_s17, %s789_s17   ;;  %s600_s16 = sphi %s649_s16, %s788_s16   ;;  %s596_s15 = sphi %s647_s15, %s787_s15  }
   0x5   : > { %s26_s23 = sadd.s32 1, %s612_s19  ;;  %s134_s24 = sadd.s32 1, %s604_s17 }
   0x6   : > { %p27_p0 = scmp.ge.s32.totalorder %s26_s23, 2  ;;  %p144_p1 = scmp.ne.s32.totalorder %s604_s17, %s600_s16 }
   0x7   : > { %p145_p2 = scmp.eq.s32.totalorder %s438_s21, 1  ;;  %p150_p3 = scmp.ne.s32.totalorder %s600_s16, %s596_s15 }
   0x8   : > { %s793_s23 = smov (%p27_p0, %s26_s23), 0  ;;  %p151_p5 = scmp.eq.s32.totalorder %s439_s22, 1 }
   0x9   : > { %p687_p4 = por %p145_p2, %p144_p1  ;;  %s129_s26 = ssub.s32 %s612_s19, %s793_s23 }
   0xa   : > { %p443_p6 = scmp.ge.s32.totalorder %s616_s20, 1  ;;  %p132_p7 = scmp.eq.s32.totalorder %s129_s26, 0 }
   0xb   : > { %p694_p8 = por %p151_p5, %p150_p3  ;;  %p192_p9 = scmp.lt.s32.totalorder %s616_s20, 3 }
   0xc   : > { %s700_s28 = scalar_select %p132_p7, %s604_s17, %s134_s24  }
   0xd   : > { %p193_p10 = pnand %p443_p6, %p192_p9 }
   0xe   : > { %v236_v0 = vld [vmem:[%s781_s1] sm:$0xff] (!%p193_p10)  ;;  %v237_v1 = vld [vmem:[%s781_s1 + $0x8] sm:$0xff] (!%p193_p10)  ;;  %vm247_vm0 = vcmask (!%p193_p10), 56320   ;;  %v618_v2 = vmov (!%p193_p10), 0.0|0.0   ;;  %p224_p11 = scmp.lt.s32.totalorder (!%p193_p10), %s608_s18, 1  ;;  %vm619_vm2 = vmmov (!%p193_p10), 0  }
   0xf   : > { %196 = sbr.rel (%p193_p10) target bundleno = 262 (0x106), region = 36  ;;  %472 = vmatprep.subr.bf16.mxu0 (!%p193_p10), %v618_v2  ;;  %v473_v3 = vpack.c.bf16 (!%p193_p10), %v237_v1, %v236_v0  ;;  %vm474_vm1 = vmpackc.low (!%p193_p10), %vm247_vm0, %vm247_vm0  ;;  %v620_v4 = vmov (!%p193_p10), 0.0   ;;  %v238_v5 = vld [vmem:[%s781_s1 + $0x10] sm:$0xff] (!%p193_p10)  ;;  %v239_v6 = vld [vmem:[%s781_s1 + $0x18] sm:$0xff] (!%p193_p10)  ;;  %s221_s22 = sand.u32 (!%p193_p10), 1, %s600_s16   ;;  %vm335_vm3 = vcmask (!%p193_p10), 261120  }
  0x10   : > { %469 = vmatprep.mubr.msk.f32.mxu0 (!%p193_p10), %vm619_vm2, %v620_v4  ;;  %v477_v7 = vpack.c.bf16 (!%p193_p10), %v239_v6, %v238_v5  ;;  %s444_s24 = sshll.u32 (!%p193_p10), %s221_s22, 3  ;;  %v446_v9 = vld [vmem:[%s782_s2] ss:$0 sm:$0xff] (!%p193_p10)  ;;  %s453_s6 = sshll.u32 (!%p193_p10), %s608_s18, 7 }
  0x11   : > { %475 = vmatpush3.bf16.xpose.msk.msra.mxu0 (!%p193_p10), %vm474_vm1, %v473_v3  ;;  %v333_v11 = vld [vmem:[%s783_s3] sm:$0xff] (!%p193_p10)  ;;  %s223_s7 = scalar_lea.vmem (!%p193_p10), [#allocation2], %s444_s24 }
  0x12   : > { %476 = vmatprep.subr.bf16.mxu0 (!%p193_p10), %v618_v2  ;;  %s352_s8 = sshll.u32 (!%p193_p10), %s223_s7, 4  ;;  %s735_s8 = int_to_ptr.vmem [resolvable:$true] %s352_s8 }
  0x13   : > { %s538_s13 = scalar_lea.vmem (!%p193_p10), %s735_s8, 128 }
  0x14   : > { %p539_p12 = scmp.ne.s32.totalorder (!%p193_p10), %s735_s8, %s538_s13 }
  0x16   : > { %s225_s11 = scalar_select %p224_p11, %s608_s18, 1 }
  0x17   : > { %p540_p13 = pnand %p539_p12, %p687_p4  ;;  %s621_s18 = smov [#allocation2]  }
  0x18   : > { %s445_s12 = sshll.u32 %s225_s11, 3  ;;  %s733_s11 = scalar_lea.hbm %s784_s4, %s453_s6 }
  0x19   : > { %479 = vmatpush3.bf16.xpose.msk.msra.mxu0 %vm474_vm1, %v477_v7  ;;  %s230_s21 = scalar_lea.vmem %s780_s0, %s445_s12  ;;  %s338_s12 = scalar_lea.sflag [#allocation3], %s221_s22 }
  0x1a   : > { %v235_v8 = vld [vmem:[%s230_s21] sm:$0xff]  ;;  %p541_p0 = pneg %p540_p13  ;;  %s542_s14 = sshll.u32 %s621_s18, 4  ;;  %s543_s14 = int_to_ptr.vmem [resolvable:$false] %s542_s14 }
  0x1b   : > { %s544_s21 = scalar_lea.vmem %s543_s14, 256  ;;  %p545_p1 = scmp.lt.s32.totalorder %s735_s8, %s543_s14 }
  0x1c   : > { %p546_p2 = scmp.lt.s32.totalorder %s544_s21, %s538_s13 }
  0x1e   : > { %p547_p3 = por %p546_p2, %p545_p1 }
  0x20   : > { %470 = vmatmul.mubr.msk.f32.vlgmr.msra.gmra.mrb[0].mxu0 %vm247_vm0, %v235_v8  ;;  %p548_p5 = pnand %p547_p3, %p541_p0 }
  0xf3   : > { %v329_v10 = vpop.f32.mrb[0].mxu0 }
  0xf4   : > { %v330_v12 = vadd.f32 %v446_v9, %v329_v10  ;;  %v471_v13 = vpop.f32.mrb[1].mxu0 }
  0xf6   : > { %v334_v14 = vadd.f32 %v333_v11, %v330_v12 }
  0xf8   : > { %336 = vst.msk [vmem:[%s223_s7] sm:$0xff] %vm335_vm3, %v334_v14 }
  0xf9   : > { %551 = shalt.err (!%p548_p5)
}
  0xfa   : > { %s552_s22 = scalar_lea.hbm %s733_s11, 128  ;;  %s556_s29 = scalar_lea.hbm %s784_s4, 256 }
  0xfb   : > { %p553_p6 = scmp.ne.s32.totalorder %s733_s11, %s552_s22  ;;  %p557_p10 = scmp.lt.u32.totalorder %s733_s11, %s784_s4 }
  0xfc   : > { %p558_p11 = scmp.lt.u32.totalorder %s556_s29, %s552_s22  ;;  %p560_p13 = scmp.lt.u32.totalorder %s552_s22, %s733_s11 }
  0xfd   : > { %p554_p7 = pnand %p553_p6, %p687_p4 }
  0xfe   : > { %p559_p12 = por %p558_p11, %p557_p10 }
  0xff   : > { %p555_p9 = pneg %p554_p7 }
 0x100   : > { %p561_p0 = por %p560_p13, %p559_p12 }
 0x102   : > { %p562_p1 = pnand %p561_p0, %p555_p9 }
 0x104   : > { %565 = shalt.err (!%p562_p1)
}
 0x105   : > { %480 = dma.vmem_to_hbm [thread:$0]  (%p687_p4), %s735_s8, 128, %s733_s11, %s338_s12  }
 0x106 PF: > { %p486_p2 = scmp.ge.s32.totalorder %s616_s20, 2  ;;  %s364_s6 = sand.u32 1, %s596_s15  }
 0x107   : > { %s365_s7 = scalar_lea.sflag [#allocation3], %s364_s6 }
 0x108   : > { %p483_p3 = pnand %p486_p2, %p694_p8 }
 0x10a   : > { %591 = dma.done.wait (!%p483_p3), %s365_s7, 128  }
 0x10b   : > { %593 = vsyncadd (!%p483_p3), %s365_s7, 4294967168  ;;  %s17_s20 = sadd.s32 1, %s616_s20   ;;  %s787_s15 = smov %s600_s16 }
 0x10c   : > { %p14_p5 = scmp.ge.s32.totalorder %s17_s20, 4   ;;  %s788_s16 = smov %s604_s17 }
 0x10d   : > { %s789_s17 = smov %s700_s28  ;;  %s790_s18 = smov %s612_s19 }
 0x10e   : > { %s791_s19 = smov %s793_s23  ;;  %16 = sbr.rel (!%p14_p5) target bundleno = 4 (0x4), region = 74 }
 0x115   :  { %370 = vsyncpa [#allocation3], 1 }
 0x116   :  { %372 = vsyncpa [#allocation3 + $0x1], 1 }

</bundles_post_ra>
